<compile_context>
chip_gen: v7x
topology: tpu7x:2x2x1
jax: 0.10.0
libtpu: 0.0.40
codegen_flags: <defaults>
</compile_context>

<pallas_src>
from functools import partial

import jax
import jax.numpy as jnp
import numpy as np
from jax.experimental import pallas as pl
from jax.experimental.pallas import tpu as pltpu


def backward_transition_kernel(x_ref, scale_ref, shift_ref, awt_ref, wah_ref, o_ref):
    # x_ref:     (N, Cin*H, W)         whole batch; channels*rows on sublanes, W on lanes
    # scale_ref: (Cin*H, 1)  f32       folded BN scale  (gamma / sqrt(var+eps), per row)
    # shift_ref: (Cin*H, 1)  f32       folded BN shift  (beta - mean*scale, per row)
    # awt_ref:   (W, 2W)     bf16      Aw^T : align_corners=True bilinear interp along W
    # wah_ref:   (Cout*2H, Cin*H) bf16 kron(Wconv, Ah): 1x1 conv fused with H interp
    # o_ref:     (N, Cout*2H, 2W)      output (free-reshapes to (N, Cout, 2H, 2W) in HBM)
    n = x_ref.shape[0]
    scale = scale_ref[...]
    shift = shift_ref[...]
    wah = wah_ref[...]
    awt = awt_ref[...]
    # Static unrolled loop over the (small) batch: tiles are tiny, so register pressure
    # is nil and full unrolling gives the scheduler maximum freedom to interleave the
    # per-image DMAs/matmuls.  For large N switch to lax.fori_loop or a batch grid axis.
    for i in range(n):
        x = x_ref[i].astype(jnp.float32)                       # (Cin*H, W)
        z = jnp.maximum(x * scale + shift, 0.0)                # BN(eval) + ReLU, f32 VPU
        # conv + H-axis upsample first (fewer MACs), bf16 MXU operands, f32 accumulate
        v = jnp.dot(wah, z.astype(jnp.bfloat16),
                    preferred_element_type=jnp.float32)        # (Cout*2H, W)
        # W-axis upsample
        o = jnp.dot(v.astype(jnp.bfloat16), awt,
                    preferred_element_type=jnp.float32)        # (Cout*2H, 2W)
        o_ref[i] = o.astype(o_ref.dtype)


def _interp_matrix_np(n_in, n_out):
    """Row-stochastic A with out = A @ in, matching F.interpolate
    (mode='bilinear'/'linear', align_corners=True) along one axis. Host-side numpy."""
    if n_in == 1:
        return np.ones((n_out, 1), np.float32)
    src = np.arange(n_out, dtype=np.float64) * (n_in - 1) / (n_out - 1)
    i0 = np.clip(np.floor(src).astype(np.int64), 0, n_in - 1)
    i1 = np.minimum(i0 + 1, n_in - 1)
    frac = (src - i0).astype(np.float32)
    a = np.zeros((n_out, n_in), np.float32)
    a[np.arange(n_out), i0] += 1.0 - frac
    a[np.arange(n_out), i1] += frac
    return a


@partial(jax.jit, static_argnames=("out_dtype",))
def _bt_call(x_nchw, scale, shift, awt, wah, *, out_dtype):
    N, Cin, H, W = x_nchw.shape
    H2, W2 = 2 * H, 2 * W
    CoutH2 = wah.shape[0]
    Cout = CoutH2 // H2

    # Free reshape (pure metadata, no transpose): NCHW -> (N, Cin*H, W)
    x2 = x_nchw.reshape(N, Cin * H, W)

    out2 = pl.pallas_call(
        backward_transition_kernel,
        out_shape=jax.ShapeDtypeStruct((N, CoutH2, W2), out_dtype),
        grid_spec=pltpu.PrefetchScalarGridSpec(
            num_scalar_prefetch=0,
            grid=(1,),  # single step: whole batch in one block (overhead-bound regime)
            in_specs=[
                pl.BlockSpec((N, Cin * H, W), lambda _: (0, 0, 0)),
                pl.BlockSpec((Cin * H, 1), lambda _: (0, 0)),
                pl.BlockSpec((Cin * H, 1), lambda _: (0, 0)),
                pl.BlockSpec((W, W2), lambda _: (0, 0)),
                pl.BlockSpec((CoutH2, Cin * H), lambda _: (0, 0)),
            ],
            out_specs=pl.BlockSpec((N, CoutH2, W2), lambda _: (0, 0, 0)),
        ),
        compiler_params=pltpu.CompilerParams(dimension_semantics=("arbitrary",)),
    )(x2, scale, shift, awt, wah)

    # Free reshape back to NCHW: (N, Cout*2H, 2W) -> (N, Cout, 2H, 2W)
    return out2.reshape(N, Cout, H2, W2)


def make_backward_transition(gamma, beta, running_mean, running_var, conv_weight,
                             *, eps=1e-5, out_dtype=None):
    """Factory: precomputes all constant operands once (inference weights/stats are
    static), returns apply(x_nchw) -> (N, Cout, 2H, 2W)."""
    gamma = np.asarray(gamma, np.float32)
    beta = np.asarray(beta, np.float32)
    mean = np.asarray(running_mean, np.float32)
    var = np.asarray(running_var, np.float32)
    wmat = np.asarray(conv_weight, np.float32)[:, :, 0, 0]       # (Cout, Cin)
    cin = gamma.shape[0]

    inv_std = 1.0 / np.sqrt(var + eps)
    scale_c = gamma * inv_std                                    # (Cin,)
    shift_c = beta - mean * scale_c                              # (Cin,)

    cache = {}  # (H, W) -> device-resident constant operands (built once per size)

    def apply(x_nchw):
        N, C, H, W = x_nchw.shape
        assert C == cin, f"expected {cin} input channels, got {C}"
        key = (H, W)
        if key not in cache:
            Ah = _interp_matrix_np(H, 2 * H)                     # (2H, H)
            Aw = _interp_matrix_np(W, 2 * W)                     # (2W, W)
            scale = jnp.asarray(np.repeat(scale_c, H)[:, None])  # (Cin*H, 1) f32
            shift = jnp.asarray(np.repeat(shift_c, H)[:, None])  # (Cin*H, 1) f32
            awt = jnp.asarray(Aw.T, dtype=jnp.bfloat16)          # (W, 2W)
            wah = jnp.asarray(np.kron(wmat, Ah), dtype=jnp.bfloat16)  # (Cout*2H, Cin*H)
            cache[key] = (scale, shift, awt, wah)
        scale, shift, awt, wah = cache[key]
        odt = x_nchw.dtype if out_dtype is None else np.dtype(out_dtype)
        return _bt_call(x_nchw, scale, shift, awt, wah, out_dtype=odt)

    return apply


def _reference(x_nchw, gamma, beta, run_mean, run_var, conv_w, eps=1e-5):
    """Pure-JAX f32 reference mirroring the PyTorch module (BN in eval mode)."""
    z = (x_nchw - run_mean[None, :, None, None]) / jnp.sqrt(run_var + eps)[None, :, None, None]
    z = z * gamma[None, :, None, None] + beta[None, :, None, None]
    z = jnp.maximum(z, 0.0)
    y = jnp.einsum("nchw,oc->nohw", z, conv_w[:, :, 0, 0])
    H, W = x_nchw.shape[2], x_nchw.shape[3]
    Ah = jnp.asarray(_interp_matrix_np(H, 2 * H))
    Aw = jnp.asarray(_interp_matrix_np(W, 2 * W))
    return jnp.einsum("nohw,Hh,Ww->noHW", y, Ah, Aw)


if __name__ == "__main__":
    N, Cin, Cout, H, W = 2, 4, 8, 16, 16

    key = jax.random.PRNGKey(0)
    kx, kw = jax.random.split(key)
    x = jax.random.normal(kx, (N, Cin, H, W), dtype=jnp.float32)

    # Deterministic (non-trivial) BatchNorm parameters / running statistics.
    gamma = 1.0 + 0.1 * jnp.arange(Cin, dtype=jnp.float32)
    beta = 0.05 * jnp.arange(Cin, dtype=jnp.float32) - 0.1
    run_mean = 0.02 * jnp.arange(Cin, dtype=jnp.float32)
    run_var = 1.0 + 0.03 * jnp.arange(Cin, dtype=jnp.float32)

    # Deterministic 1x1 conv weight, PyTorch layout (Cout, Cin, 1, 1), no bias.
    conv_w = 0.1 * jax.random.normal(kw, (Cout, Cin, 1, 1), dtype=jnp.float32)

    # Build once (constants hoisted), then call (single pallas_call, one grid step).
    bt = make_backward_transition(gamma, beta, run_mean, run_var, conv_w)
    out = jax.block_until_ready(bt(x))

    assert out.shape == (N, Cout, 2 * H, 2 * W), out.shape

    ref = jax.block_until_ready(_reference(x, gamma, beta, run_mean, run_var, conv_w))
    # bf16 MXU operands (f32 accumulation) -> loosened tolerance vs the f32 reference.
    np.testing.assert_allclose(np.asarray(out), np.asarray(ref), rtol=2e-2, atol=2e-2)

    print("KERNEL_OK")
</pallas_src>

<mosaic_0001>
module attributes {stable_mosaic.version = 11 : i64} {
  func.func @backward_transition_kernel(%arg0: i32, %arg1: memref<2x64x16xf32, #tpu.memory_space<vmem>>, %arg2: memref<64x1xf32, #tpu.memory_space<vmem>>, %arg3: memref<64x1xf32, #tpu.memory_space<vmem>>, %arg4: memref<16x32xbf16, #tpu.memory_space<vmem>>, %arg5: memref<256x64xbf16, #tpu.memory_space<vmem>>, %arg6: memref<2x256x32xf32, #tpu.memory_space<vmem>>) attributes {dimension_semantics = [#tpu.dimension_semantics<arbitrary>], iteration_bounds = array<i64: 1>, scalar_prefetch = 0 : i64, scratch_operands = 0 : i64, tpu.core_type = #tpu.core_type<tc>, window_params = [{pipeline_mode = #tpu.pipeline_mode<synchronous>, transform_indices = @transform_0, window_bounds = array<i64: 2, 64, 16>}, {pipeline_mode = #tpu.pipeline_mode<synchronous>, transform_indices = @transform_1, window_bounds = array<i64: 64, 1>}, {pipeline_mode = #tpu.pipeline_mode<synchronous>, transform_indices = @transform_2, window_bounds = array<i64: 64, 1>}, {pipeline_mode = #tpu.pipeline_mode<synchronous>, transform_indices = @transform_3, window_bounds = array<i64: 16, 32>}, {pipeline_mode = #tpu.pipeline_mode<synchronous>, transform_indices = @transform_4, window_bounds = array<i64: 256, 64>}, {pipeline_mode = #tpu.pipeline_mode<synchronous>, transform_indices = @transform_5, window_bounds = array<i64: 2, 256, 32>}]} {
    %c0 = arith.constant 0 : index
    %c0_0 = arith.constant 0 : index
    %0 = vector.load %arg2[%c0, %c0_0] : memref<64x1xf32, #tpu.memory_space<vmem>>, vector<64x1xf32>
    %c0_1 = arith.constant 0 : index
    %c0_2 = arith.constant 0 : index
    %1 = vector.load %arg3[%c0_1, %c0_2] : memref<64x1xf32, #tpu.memory_space<vmem>>, vector<64x1xf32>
    %c0_3 = arith.constant 0 : index
    %c0_4 = arith.constant 0 : index
    %2 = vector.load %arg5[%c0_3, %c0_4] : memref<256x64xbf16, #tpu.memory_space<vmem>>, vector<256x64xbf16>
    %c0_5 = arith.constant 0 : index
    %c0_6 = arith.constant 0 : index
    %3 = vector.load %arg4[%c0_5, %c0_6] : memref<16x32xbf16, #tpu.memory_space<vmem>>, vector<16x32xbf16>
    %c0_7 = arith.constant 0 : index
    %c0_8 = arith.constant 0 : index
    %c0_9 = arith.constant 0 : index
    %4 = vector.load %arg1[%c0_7, %c0_8, %c0_9] : memref<2x64x16xf32, #tpu.memory_space<vmem>>, vector<1x64x16xf32>
    %5 = vector.shape_cast %4 : vector<1x64x16xf32> to vector<64x16xf32>
    %6 = vector.broadcast %0 : vector<64x1xf32> to vector<64x16xf32>
    %7 = arith.mulf %5, %6 : vector<64x16xf32>
    %8 = vector.broadcast %1 : vector<64x1xf32> to vector<64x16xf32>
    %9 = arith.addf %7, %8 : vector<64x16xf32>
    %cst = arith.constant 0.000000e+00 : f32
    %10 = vector.broadcast %cst : f32 to vector<64x16xf32>
    %11 = arith.maximumf %9, %10 : vector<64x16xf32>
    %12 = arith.truncf %11 : vector<64x16xf32> to vector<64x16xbf16>
    %cst_10 = arith.constant dense<0.000000e+00> : vector<256x16xf32>
    %13 = tpu.matmul %2, %12, %cst_10 {dimension_numbers = #tpu.dot_dimension_numbers<[1], [0], [0], [1], [0, 0, 1, 1], [], []>} : vector<256x64xbf16>, vector<64x16xbf16>, vector<256x16xf32> -> vector<256x16xf32>
    %14 = arith.truncf %13 : vector<256x16xf32> to vector<256x16xbf16>
    %cst_11 = arith.constant dense<0.000000e+00> : vector<256x32xf32>
    %15 = tpu.matmul %14, %3, %cst_11 {dimension_numbers = #tpu.dot_dimension_numbers<[1], [0], [0], [1], [0, 0, 1, 1], [], []>} : vector<256x16xbf16>, vector<16x32xbf16>, vector<256x32xf32> -> vector<256x32xf32>
    %c0_12 = arith.constant 0 : index
    %c0_13 = arith.constant 0 : index
    %c0_14 = arith.constant 0 : index
    %16 = vector.load %arg6[%c0_12, %c0_13, %c0_14] : memref<2x256x32xf32, #tpu.memory_space<vmem>>, vector<1x256x32xf32>
    %17 = vector.shape_cast %16 : vector<1x256x32xf32> to vector<256x32xf32>
    %18 = vector.shape_cast %15 : vector<256x32xf32> to vector<1x256x32xf32>
    tpu.vector_store %arg6[%c0_12, %c0_13, %c0_14], %18 {strides = array<i32>} : memref<2x256x32xf32, #tpu.memory_space<vmem>>, vector<1x256x32xf32>,
    %c1 = arith.constant 1 : index
    %c0_15 = arith.constant 0 : index
    %c0_16 = arith.constant 0 : index
    %19 = vector.load %arg1[%c1, %c0_15, %c0_16] : memref<2x64x16xf32, #tpu.memory_space<vmem>>, vector<1x64x16xf32>
    %20 = vector.shape_cast %19 : vector<1x64x16xf32> to vector<64x16xf32>
    %21 = vector.broadcast %0 : vector<64x1xf32> to vector<64x16xf32>
    %22 = arith.mulf %20, %21 : vector<64x16xf32>
    %23 = vector.broadcast %1 : vector<64x1xf32> to vector<64x16xf32>
    %24 = arith.addf %22, %23 : vector<64x16xf32>
    %cst_17 = arith.constant 0.000000e+00 : f32
    %25 = vector.broadcast %cst_17 : f32 to vector<64x16xf32>
    %26 = arith.maximumf %24, %25 : vector<64x16xf32>
    %27 = arith.truncf %26 : vector<64x16xf32> to vector<64x16xbf16>
    %cst_18 = arith.constant dense<0.000000e+00> : vector<256x16xf32>
    %28 = tpu.matmul %2, %27, %cst_18 {dimension_numbers = #tpu.dot_dimension_numbers<[1], [0], [0], [1], [0, 0, 1, 1], [], []>} : vector<256x64xbf16>, vector<64x16xbf16>, vector<256x16xf32> -> vector<256x16xf32>
    %29 = arith.truncf %28 : vector<256x16xf32> to vector<256x16xbf16>
    %cst_19 = arith.constant dense<0.000000e+00> : vector<256x32xf32>
    %30 = tpu.matmul %29, %3, %cst_19 {dimension_numbers = #tpu.dot_dimension_numbers<[1], [0], [0], [1], [0, 0, 1, 1], [], []>} : vector<256x16xbf16>, vector<16x32xbf16>, vector<256x32xf32> -> vector<256x32xf32>
    %c1_20 = arith.constant 1 : index
    %c0_21 = arith.constant 0 : index
    %c0_22 = arith.constant 0 : index
    %31 = vector.load %arg6[%c1_20, %c0_21, %c0_22] : memref<2x256x32xf32, #tpu.memory_space<vmem>>, vector<1x256x32xf32>
    %32 = vector.shape_cast %31 : vector<1x256x32xf32> to vector<256x32xf32>
    %33 = vector.shape_cast %30 : vector<256x32xf32> to vector<1x256x32xf32>
    tpu.vector_store %arg6[%c1_20, %c0_21, %c0_22], %33 {strides = array<i32>} : memref<2x256x32xf32, #tpu.memory_space<vmem>>, vector<1x256x32xf32>,
    return
  }
  func.func @transform_0(%arg0: i32) -> (i32, i32, i32) {
    %c0_i32 = arith.constant 0 : i32
    %c0_i32_0 = arith.constant 0 : i32
    %c0_i32_1 = arith.constant 0 : i32
    %c0_i32_2 = arith.constant 0 : i32
    return %c0_i32, %c0_i32_0, %c0_i32_1 : i32, i32, i32
  }
  func.func @transform_1(%arg0: i32) -> (i32, i32) {
    %c0_i32 = arith.constant 0 : i32
    %c0_i32_0 = arith.constant 0 : i32
    %c0_i32_1 = arith.constant 0 : i32
    return %c0_i32, %c0_i32_0 : i32, i32
  }
  func.func @transform_2(%arg0: i32) -> (i32, i32) {
    %c0_i32 = arith.constant 0 : i32
    %c0_i32_0 = arith.constant 0 : i32
    %c0_i32_1 = arith.constant 0 : i32
    return %c0_i32, %c0_i32_0 : i32, i32
  }
  func.func @transform_3(%arg0: i32) -> (i32, i32) {
    %c0_i32 = arith.constant 0 : i32
    %c0_i32_0 = arith.constant 0 : i32
    %c0_i32_1 = arith.constant 0 : i32
    return %c0_i32, %c0_i32_0 : i32, i32
  }
  func.func @transform_4(%arg0: i32) -> (i32, i32) {
    %c0_i32 = arith.constant 0 : i32
    %c0_i32_0 = arith.constant 0 : i32
    %c0_i32_1 = arith.constant 0 : i32
    return %c0_i32, %c0_i32_0 : i32, i32
  }
  func.func @transform_5(%arg0: i32) -> (i32, i32, i32) {
    %c0_i32 = arith.constant 0 : i32
    %c0_i32_0 = arith.constant 0 : i32
    %c0_i32_1 = arith.constant 0 : i32
    %c0_i32_2 = arith.constant 0 : i32
    return %c0_i32, %c0_i32_0, %c0_i32_1 : i32, i32, i32
  }
}

</mosaic_0001>

<bundles_post_ra>
// kernel: _bt_call.1
= control target key start
LH: loop header
LB: loop body
LE: loop exit
PB: predicated region body
PF: predicated region fallthrough
CT: control target
= control target key end

     0   :  { %v1573_v2 = vmov 0   ;;  %s1980_s0 = inlined_call_operand.vmem [shape: f32[2,64,16], index: 0, kind: input, shape index: {}]   ;;  %s1981_s1 = inlined_call_operand.vmem [shape: f32[64,1], index: 1, kind: input, shape index: {}]   ;;  %s1982_s2 = inlined_call_operand.vmem [shape: f32[64,1], index: 2, kind: input, shape index: {}]   ;;  %s1983_s3 = inlined_call_operand.vmem [shape: bf16[16,32], index: 3, kind: input, shape index: {}]   ;;  %s1984_s4 = inlined_call_operand.vmem [shape: bf16[256,64], index: 4, kind: input, shape index: {}]   ;;  %s1985_s5 = inlined_call_operand.hbm [shape: f32[2,256,32], index: 5, kind: output, shape index: {}]  }
   0x1   :  { %v30_v0 = vld [vmem:[%s1982_s2] sm:$0xff]  ;;  %1531 = vset.pattern.permute.xlu1 %v1573_v2  ;;  %1530 = vset.pattern.permute.xlu0 %v1573_v2  ;;  %v31_v3 = vld [vmem:[%s1982_s2 + $0x8] sm:$0xff]  ;;  %v25_v5 = vld [vmem:[%s1981_s1 + $0x18] sm:$0xff] }
   0x2   :  { %v22_v1 = vld [vmem:[%s1981_s1] sm:$0xff]  ;;  %130 = vperm.xlu1 %1531, %v30_v0   ;;  %v23_v4 = vld [vmem:[%s1981_s1 + $0x8] sm:$0xff]  ;;  %v24_v6 = vld [vmem:[%s1981_s1 + $0x10] sm:$0xff] }
   0x3   :  { %82 = vperm.xlu0 %1530, %v22_v1   ;;  %v33_v7 = vld [vmem:[%s1982_s2 + $0x18] sm:$0xff]  ;;  %v32_v8 = vld [vmem:[%s1982_s2 + $0x10] sm:$0xff]  ;;  %v1634_v9 = vld [vmem:[%s1983_s3] sm:$0xff]  }
   0x4   :  { %v27_v10 = vld [vmem:[%s1981_s1 + $0x28] sm:$0xff]  ;;  %v26_v11 = vld [vmem:[%s1981_s1 + $0x20] sm:$0xff]  ;;  %1418 = vmatprep.subr.bf16.mxu1 %v1634_v9 }
   0x5   :  { %1419 = vmatpush3.bf16.msra.mxu1 %v1634_v9  ;;  %v35_v12 = vld [vmem:[%s1982_s2 + $0x28] sm:$0xff]  ;;  %v34_v13 = vld [vmem:[%s1982_s2 + $0x20] sm:$0xff] }
   0x6   :  { %135 = vperm.xlu1 %1531, %v31_v3  }
   0x7   :  { %87 = vperm.xlu0 %1530, %v23_v4  }
   0xa   :  { %97 = vperm.xlu1 %1531, %v25_v5  }
   0xb   :  { %92 = vperm.xlu0 %1530, %v24_v6  }
   0xe   :  { %145 = vperm.xlu1 %1531, %v33_v7  }
   0xf   :  { %140 = vperm.xlu0 %1530, %v32_v8  }
  0x12   :  { %107 = vperm.xlu1 %1531, %v27_v10  }
  0x13   :  { %102 = vperm.xlu0 %1530, %v26_v11  }
  0x14   :  { %10 = vsyncpa [#allocation3], 0  ;;  %v29_v14 = vld [vmem:[%s1981_s1 + $0x38] sm:$0xff]  ;;  %v28_v15 = vld [vmem:[%s1981_s1 + $0x30] sm:$0xff]  ;;  %vm268_vm0 = vcmask 523264   ;;  %vm500_vm1 = vcmask 130048  }
  0x15   :  { %v37_v16 = vld [vmem:[%s1982_s2 + $0x38] sm:$0xff]  ;;  %v36_v17 = vld [vmem:[%s1982_s2 + $0x30] sm:$0xff]  ;;  %v1665_v18 = vld [vmem:[%s1984_s4] sm:$0xff]   ;;  %vm710_vm2 = vcmask 261120  }
  0x16   :  { %155 = vperm.xlu1 %1531, %v35_v12   ;;  %1386 = vmatprep.mubr.msk.bf16.mxu0 %vm268_vm0, %v1665_v18  ;;  %v1264_v19 = vld [vmem:[%s1980_s0 + $0x40] sm:$0xff]  ;;  %v73_v25 = vld [vmem:[%s1980_s0 + $0x8] sm:$0xff]  ;;  %v75_v35 = vld [vmem:[%s1980_s0 + $0x18] sm:$0xff] }
  0x17   :  { %150 = vperm.xlu0 %1530, %v34_v13   ;;  %v72_v20 = vld [vmem:[%s1980_s0] sm:$0xff]  ;;  %v1265_v26 = vld [vmem:[%s1980_s0 + $0x48] sm:$0xff]  ;;  %v1267_v36 = vld [vmem:[%s1980_s0 + $0x58] sm:$0xff] }
  0x18   :  { %v74_v38 = vld [vmem:[%s1980_s0 + $0x10] sm:$0xff]  ;;  %v77_v61 = vld [vmem:[%s1980_s0 + $0x28] sm:$0xff]  ;;  %v76_v0 = vld [vmem:[%s1980_s0 + $0x20] sm:$0xff] }
  0x19   :  { %v1266_v39 = vld [vmem:[%s1980_s0 + $0x50] sm:$0xff]  ;;  %v1269_v62 = vld [vmem:[%s1980_s0 + $0x68] sm:$0xff]  ;;  %v1268_v1 = vld [vmem:[%s1980_s0 + $0x60] sm:$0xff] }
  0x1a   :  { %117 = vperm.xlu1 %1531, %v29_v14  }
  0x1b   :  { %112 = vperm.xlu0 %1530, %v28_v15  }
  0x1e   :  { %165 = vperm.xlu1 %1531, %v37_v16  }
  0x1f   :  { %160 = vperm.xlu0 %1530, %v36_v17  }
  0x81   :  { %v131_v21 = vpop.permute.xlu1 %130 }
  0x82   :  { %v83_v22 = vpop.permute.xlu0 %82 }
  0x83   :  { %v752_v23 = vmul.f32 %v1264_v19, %v83_v22  ;;  %v120_v24 = vmul.f32 %v83_v22, %v72_v20  ;;  %v1271_v22 = vld [vmem:[%s1980_s0 + $0x78] sm:$0xff] }
  0x85   :  { %v136_v27 = vpop.permute.xlu1 %135  ;;  %v760_v29 = vadd.f32 %v752_v23, %v131_v21  ;;  %v168_v32 = vadd.f32 %v131_v21, %v120_v24  ;;  %v79_v21 = vld [vmem:[%s1980_s0 + $0x38] sm:$0xff]  ;;  %v78_v24 = vld [vmem:[%s1980_s0 + $0x30] sm:$0xff] }
  0x86   :  { %v88_v28 = vpop.permute.xlu0 %87 }
  0x87   :  { %v121_v30 = vmul.f32 %v88_v28, %v73_v25  ;;  %v753_v31 = vmul.f32 %v1265_v26, %v88_v28  ;;  %v768_v41 = vmax.f32 %v760_v29, 0.0  ;;  %v176_v44 = vmax.f32 %v168_v32, 0.0  ;;  %v1270_v25 = vld [vmem:[%s1980_s0 + $0x70] sm:$0xff] }
  0x89   :  { %v169_v33 = vadd.f32 %v136_v27, %v121_v30  ;;  %v761_v34 = vadd.f32 %v753_v31, %v136_v27  ;;  %v98_v37 = vpop.permute.xlu1 %97 }
  0x8a   :  { %v93_v40 = vpop.permute.xlu0 %92  ;;  %v123_v43 = vmul.f32 %v98_v37, %v75_v35  ;;  %v755_v46 = vmul.f32 %v1267_v36, %v98_v37 }
  0x8b   :  { %v769_v42 = vmax.f32 %v761_v34, 0.0  ;;  %v177_v45 = vmax.f32 %v169_v33, 0.0  ;;  %v122_v47 = vmul.f32 %v93_v40, %v74_v38  ;;  %v754_v48 = vmul.f32 %v1266_v39, %v93_v40 }
  0x8d   :  { %v1693_v49 = vpack.c.bf16 %v769_v42, %v768_v41  ;;  %v146_v50 = vpop.permute.xlu1 %145  ;;  %v184_v52 = vpack.c.bf16 %v177_v45, %v176_v44  ;;  %v1729_v45 = vld [vmem:[%s1984_s4 + $0x8] sm:$0xff]  }
  0x8e   :  { %v141_v51 = vpop.permute.xlu0 %140  ;;  %v171_v53 = vadd.f32 %v146_v50, %v123_v43  ;;  %v763_v54 = vadd.f32 %v755_v46, %v146_v50  ;;  %v1734_v46 = vld [vmem:[%s1984_s4 + $0x10] sm:$0xff]  }
  0x8f   :  { %v170_v55 = vadd.f32 %v141_v51, %v122_v47  ;;  %v762_v56 = vadd.f32 %v754_v48, %v141_v51  ;;  %1452 = vmatprep.subr.bf16.mxu1 %v1693_v49  ;;  %1378 = vmatprep.subr.bf16.mxu0 %v184_v52  ;;  %v1745_v47 = vld [vmem:[%s1984_s4 + $0x18] sm:$0xff]   ;;  %v1750_v48 = vld [vmem:[%s1984_s4 + $0x20] sm:$0xff]   ;;  %v1764_v50 = vld [vmem:[%s1984_s4 + $0x30] sm:$0xff]  }
  0x90   :  { %v179_v57 = vmax.f32 %v171_v53, 0.0  ;;  %v771_v58 = vmax.f32 %v763_v54, 0.0  ;;  %1379 = vmatpush3.bf16.msra.mxu0 %v184_v52  ;;  %v1773_v51 = vld [vmem:[%s1984_s4 + $0x38] sm:$0xff]   ;;  %v1778_v52 = vld [vmem:[%s1984_s4 + $0x40] sm:$0xff]   ;;  %v1787_v53 = vld [vmem:[%s1984_s4 + $0x48] sm:$0xff]  }
  0x91   :  { %v178_v59 = vmax.f32 %v170_v55, 0.0  ;;  %v770_v60 = vmax.f32 %v762_v56, 0.0  ;;  %v108_v63 = vpop.permute.xlu1 %107  ;;  %v1792_v54 = vld [vmem:[%s1984_s4 + $0x50] sm:$0xff]   ;;  %v1801_v55 = vld [vmem:[%s1984_s4 + $0x58] sm:$0xff]   ;;  %v1806_v56 = vld [vmem:[%s1984_s4 + $0x60] sm:$0xff]  }
  0x92   :  { %v103_v2 = vpop.permute.xlu0 %102  ;;  %v125_v5 = vmul.f32 %v108_v63, %v77_v61  ;;  %v757_v6 = vmul.f32 %v1269_v62, %v108_v63 }
  0x93   :  { %v185_v3 = vpack.c.bf16 %v179_v57, %v178_v59  ;;  %v1708_v4 = vpack.c.bf16 %v771_v58, %v770_v60  ;;  %v124_v7 = vmul.f32 %v103_v2, %v76_v0  ;;  %v756_v8 = vmul.f32 %v1268_v1, %v103_v2  ;;  %v1815_v57 = vld [vmem:[%s1984_s4 + $0x68] sm:$0xff]   ;;  %v1820_v58 = vld [vmem:[%s1984_s4 + $0x70] sm:$0xff]   ;;  %v1829_v59 = vld [vmem:[%s1984_s4 + $0x78] sm:$0xff]  }
  0x95   :  { %1380 = vmatprep.subr.bf16.mxu0 %v185_v3  ;;  %v156_v10 = vpop.permute.xlu1 %155 }
  0x96   :  { %v151_v11 = vpop.permute.xlu0 %150  ;;  %v173_v12 = vadd.f32 %v156_v10, %v125_v5  ;;  %v765_v13 = vadd.f32 %v757_v6, %v156_v10  ;;  %1381 = vmatpush3.bf16.msra.mxu0 %v185_v3 }
  0x97   :  { %v172_v14 = vadd.f32 %v151_v11, %v124_v7  ;;  %v764_v15 = vadd.f32 %v756_v8, %v151_v11 }
  0x98   :  { %v181_v16 = vmax.f32 %v173_v12, 0.0  ;;  %v773_v17 = vmax.f32 %v765_v13, 0.0 }
  0x99   :  { %v180_v19 = vmax.f32 %v172_v14, 0.0  ;;  %v772_v20 = vmax.f32 %v764_v15, 0.0  ;;  %v118_v23 = vpop.permute.xlu1 %117 }
  0x9a   :  { %v113_v26 = vpop.permute.xlu0 %112  ;;  %v127_v29 = vmul.f32 %v118_v23, %v79_v21  ;;  %v759_v30 = vmul.f32 %v1271_v22, %v118_v23 }
  0x9b   :  { %v186_v27 = vpack.c.bf16 %v181_v16, %v180_v19  ;;  %v1722_v28 = vpack.c.bf16 %v773_v17, %v772_v20  ;;  %v126_v31 = vmul.f32 %v113_v26, %v78_v24  ;;  %v758_v32 = vmul.f32 %v1270_v25, %v113_v26 }
  0x9d   :  { %1382 = vmatprep.subr.bf16.mxu0 %v186_v27  ;;  %v166_v33 = vpop.permute.xlu1 %165 }
  0x9e   :  { %v161_v34 = vpop.permute.xlu0 %160  ;;  %v175_v35 = vadd.f32 %v166_v33, %v127_v29  ;;  %v767_v36 = vadd.f32 %v759_v30, %v166_v33  ;;  %1383 = vmatpush3.bf16.msra.mxu0 %v186_v27 }
  0x9f   :  { %v174_v37 = vadd.f32 %v161_v34, %v126_v31  ;;  %v766_v38 = vadd.f32 %v758_v32, %v161_v34 }
  0xa0   :  { %v183_v39 = vmax.f32 %v175_v35, 0.0  ;;  %v775_v40 = vmax.f32 %v767_v36, 0.0 }
  0xa1   :  { %v182_v41 = vmax.f32 %v174_v37, 0.0  ;;  %v774_v42 = vmax.f32 %v766_v38, 0.0 }
  0xa3   :  { %v187_v43 = vpack.c.bf16 %v183_v39, %v182_v41  ;;  %v1724_v44 = vpack.c.bf16 %v775_v40, %v774_v42 }
  0xa5   :  { %1384 = vmatprep.subr.bf16.mxu0 %v187_v43 }
  0xa6   :  { %1385 = vmatpush3.bf16.msra.mxu0 %v187_v43 }
  0xa7   :  { %1492 = vmatprep.subr.bf16.mxu0 %v1634_v9 }
  0xa9   :  { %1387 = vmatmul.mubr.msk.bf16.vlgmr.msra.gmra.mrb[0].mxu0 %vm268_vm0, %v1729_v45 }
  0xaa   :  { %1390 = vmatprep.mubr.msk.bf16.mxu0 %vm268_vm0, %v1734_v46  ;;  %1493 = vmatpush3.bf16.msra.mxu0 %v1634_v9  ;;  %v1759_v9 = vld [vmem:[%s1984_s4 + $0x28] sm:$0xff]   ;;  %s1574_s4 = smov [#allocation2]  }
  0xab   :  { %s1204_s2 = sshll.u32 %s1574_s4, 4  ;;  %s1205_s2 = int_to_ptr.vmem [resolvable:$true] %s1204_s2 }
  0xac   :  { %s1549_s6 = scalar_lea.vmem %s1205_s2, 8192  ;;  %p1554_p1 = scmp.lt.s32.totalorder %s1205_s2, %s1205_s2 }
  0xad   :  { %p1550_p0 = scmp.ne.s32.totalorder %s1205_s2, %s1549_s6  ;;  %p1555_p2 = scmp.lt.s32.totalorder %s1549_s6, %s1549_s6 }
  0xaf   :  { %p1556_p3 = por %p1555_p2, %p1554_p1 }
  0xb1   :  { %1391 = vmatmul.mubr.msk.bf16.gmra.mrb[4].mxu0 %vm268_vm0, %v1745_v47  ;;  %p1557_p4 = pnand %p1556_p3, %p1550_p0 }
  0xb2   :  { %1394 = vmatprep.mubr.msk.bf16.mxu0 %vm268_vm0, %v1750_v48 }
  0xb9   :  { %1395 = vmatmul.mubr.msk.bf16.gmra.mrb[8].mxu0 %vm268_vm0, %v1759_v9 }
  0xba   :  { %1398 = vmatprep.mubr.msk.bf16.mxu0 %vm268_vm0, %v1764_v50 }
  0xc1   :  { %1399 = vmatmul.mubr.msk.bf16.gmra.mrb[12].mxu0 %vm268_vm0, %v1773_v51 }
  0xc2   :  { %1402 = vmatprep.mubr.msk.bf16.mxu0 %vm268_vm0, %v1778_v52 }
  0xc9   :  { %1403 = vmatmul.mubr.msk.bf16.gmra.mrb[16].mxu0 %vm268_vm0, %v1787_v53 }
  0xca   :  { %1406 = vmatprep.mubr.msk.bf16.mxu0 %vm268_vm0, %v1792_v54 }
  0xd1   :  { %1407 = vmatmul.mubr.msk.bf16.gmra.mrb[20].mxu0 %vm268_vm0, %v1801_v55 }
  0xd2   :  { %1410 = vmatprep.mubr.msk.bf16.mxu0 %vm268_vm0, %v1806_v56 }
  0xd9   :  { %1411 = vmatmul.mubr.msk.bf16.gmra.mrb[24].mxu0 %vm268_vm0, %v1815_v57 }
  0xda   :  { %1414 = vmatprep.mubr.msk.bf16.mxu0 %vm268_vm0, %v1820_v58 }
  0xe1   :  { %1415 = vmatmul.mubr.msk.bf16.gmra.mrb[28].mxu0 %vm268_vm0, %v1829_v59 }
 0x17c   :  { %v1388_v60 = vpop.f32.mrb[0].mxu0 }
 0x17d   :  { %v351_v61 = vpop.f32.mrb[1].mxu0 }
 0x17e   :  { %v1389_v62 = vpop.f32.mrb[2].mxu0 }
 0x17f   :  { %v479_v63 = vpack.c.bf16 %v1389_v62, %v1388_v60  ;;  %v354_v0 = vpop.f32.mrb[3].mxu0 }
 0x180   :  { %v478_v1 = vpack.c.bf16 %v354_v0, %v351_v61 }
 0x182   :  { %1420 = vmatprep.mubr.msk.bf16.mxu1 %vm500_vm1, %v478_v1 }
 0x183   :  { %1421 = vmatmul.mubr.msk.bf16.vlgmr.msra.gmra.mrb[0].mxu1 %vm500_vm1, %v479_v63 }
 0x184   :  { %1453 = vmatpush3.bf16.msra.mxu1 %v1693_v49  ;;  %v1392_v2 = vpop.f32.mrb[4].mxu0 }
 0x185   :  { %1454 = vmatprep.subr.bf16.mxu1 %v1708_v4  ;;  %v367_v3 = vpop.f32.mrb[5].mxu0 }
 0x186   :  { %v1393_v5 = vpop.f32.mrb[6].mxu0 }
 0x187   :  { %v481_v6 = vpack.c.bf16 %v1393_v5, %v1392_v2  ;;  %v370_v7 = vpop.f32.mrb[7].mxu0 }
 0x188   :  { %v480_v8 = vpack.c.bf16 %v370_v7, %v367_v3  ;;  %1455 = vmatpush3.bf16.msra.mxu1 %v1708_v4 }
 0x189   :  { %1456 = vmatprep.subr.bf16.mxu1 %v1722_v28 }
 0x18a   :  { %1424 = vmatprep.mubr.msk.bf16.mxu1 %vm500_vm1, %v480_v8 }
 0x18b   :  { %1425 = vmatmul.mubr.msk.bf16.gmra.mrb[4].mxu1 %vm500_vm1, %v481_v6 }
 0x18c   :  { %1457 = vmatpush3.bf16.msra.mxu1 %v1722_v28  ;;  %v1396_v10 = vpop.f32.mrb[8].mxu0 }
 0x18d   :  { %1458 = vmatprep.subr.bf16.mxu1 %v1724_v44  ;;  %v383_v49 = vpop.f32.mrb[9].mxu0 }
 0x18e   :  { %v1397_v11 = vpop.f32.mrb[10].mxu0 }
 0x18f   :  { %v483_v12 = vpack.c.bf16 %v1397_v11, %v1396_v10  ;;  %v386_v13 = vpop.f32.mrb[11].mxu0 }
 0x190   :  { %v482_v14 = vpack.c.bf16 %v386_v13, %v383_v49  ;;  %1459 = vmatpush3.bf16.msra.mxu1 %v1724_v44 }
 0x192   :  { %1428 = vmatprep.mubr.msk.bf16.mxu1 %vm500_vm1, %v482_v14 }
 0x193   :  { %1429 = vmatmul.mubr.msk.bf16.gmra.mrb[8].mxu1 %vm500_vm1, %v483_v12 }
 0x194   :  { %v1400_v4 = vpop.f32.mrb[12].mxu0 }
 0x195   :  { %v399_v15 = vpop.f32.mrb[13].mxu0 }
 0x196   :  { %v1401_v16 = vpop.f32.mrb[14].mxu0 }
 0x197   :  { %v485_v17 = vpack.c.bf16 %v1401_v16, %v1400_v4  ;;  %v402_v19 = vpop.f32.mrb[15].mxu0 }
 0x198   :  { %v484_v20 = vpack.c.bf16 %v402_v19, %v399_v15 }
 0x19a   :  { %1432 = vmatprep.mubr.msk.bf16.mxu1 %vm500_vm1, %v484_v20 }
 0x19b   :  { %1433 = vmatmul.mubr.msk.bf16.gmra.mrb[12].mxu1 %vm500_vm1, %v485_v17 }
 0x19c   :  { %v1404_v21 = vpop.f32.mrb[16].mxu0 }
 0x19d   :  { %v415_v22 = vpop.f32.mrb[17].mxu0 }
 0x19e   :  { %v1405_v23 = vpop.f32.mrb[18].mxu0 }
 0x19f   :  { %v487_v24 = vpack.c.bf16 %v1405_v23, %v1404_v21  ;;  %v418_v25 = vpop.f32.mrb[19].mxu0 }
 0x1a0   :  { %v486_v26 = vpack.c.bf16 %v418_v25, %v415_v22 }
 0x1a2   :  { %1436 = vmatprep.mubr.msk.bf16.mxu1 %vm500_vm1, %v486_v26 }
 0x1a3   :  { %1437 = vmatmul.mubr.msk.bf16.gmra.mrb[16].mxu1 %vm500_vm1, %v487_v24 }
 0x1a4   :  { %v1408_v27 = vpop.f32.mrb[20].mxu0 }
 0x1a5   :  { %v431_v28 = vpop.f32.mrb[21].mxu0 }
 0x1a6   :  { %v1409_v29 = vpop.f32.mrb[22].mxu0 }
 0x1a7   :  { %v489_v30 = vpack.c.bf16 %v1409_v29, %v1408_v27  ;;  %v434_v31 = vpop.f32.mrb[23].mxu0 }
 0x1a8   :  { %v488_v32 = vpack.c.bf16 %v434_v31, %v431_v28 }
 0x1aa   :  { %1440 = vmatprep.mubr.msk.bf16.mxu1 %vm500_vm1, %v488_v32 }
 0x1ab   :  { %1441 = vmatmul.mubr.msk.bf16.gmra.mrb[20].mxu1 %vm500_vm1, %v489_v30 }
 0x1ac   :  { %v1412_v33 = vpop.f32.mrb[24].mxu0 }
 0x1ad   :  { %v447_v34 = vpop.f32.mrb[25].mxu0 }
 0x1ae   :  { %v1413_v35 = vpop.f32.mrb[26].mxu0 }
 0x1af   :  { %v491_v36 = vpack.c.bf16 %v1413_v35, %v1412_v33  ;;  %v450_v37 = vpop.f32.mrb[27].mxu0 }
 0x1b0   :  { %v490_v38 = vpack.c.bf16 %v450_v37, %v447_v34 }
 0x1b2   :  { %1444 = vmatprep.mubr.msk.bf16.mxu1 %vm500_vm1, %v490_v38 }
 0x1b3   :  { %1445 = vmatmul.mubr.msk.bf16.gmra.mrb[24].mxu1 %vm500_vm1, %v491_v36 }
 0x1b4   :  { %v1416_v39 = vpop.f32.mrb[28].mxu0 }
 0x1b5   :  { %v463_v40 = vpop.f32.mrb[29].mxu0 }
 0x1b6   :  { %v1417_v41 = vpop.f32.mrb[30].mxu0 }
 0x1b7   :  { %v493_v42 = vpack.c.bf16 %v1417_v41, %v1416_v39  ;;  %v466_v43 = vpop.f32.mrb[31].mxu0 }
 0x1b8   :  { %v492_v44 = vpack.c.bf16 %v466_v43, %v463_v40 }
 0x1ba   :  { %1448 = vmatprep.mubr.msk.bf16.mxu1 %vm500_vm1, %v492_v44 }
 0x1bb   :  { %1449 = vmatmul.mubr.msk.bf16.gmra.mrb[28].mxu1 %vm500_vm1, %v493_v42 }
 0x1bc   :  { %1460 = vmatprep.mubr.msk.bf16.mxu1 %vm268_vm0, %v1665_v18 }
 0x1c3   :  { %1461 = vmatmul.mubr.msk.bf16.vlgmr.msra.gmra.mrb[32].mxu1 %vm268_vm0, %v1729_v45 }
 0x1c4   :  { %1464 = vmatprep.mubr.msk.bf16.mxu1 %vm268_vm0, %v1734_v46 }
 0x1cb   :  { %1465 = vmatmul.mubr.msk.bf16.gmra.mrb[36].mxu1 %vm268_vm0, %v1745_v47 }
 0x1cc   :  { %1468 = vmatprep.mubr.msk.bf16.mxu1 %vm268_vm0, %v1750_v48 }
 0x1d3   :  { %1469 = vmatmul.mubr.msk.bf16.gmra.mrb[40].mxu1 %vm268_vm0, %v1759_v9 }
 0x1d4   :  { %1472 = vmatprep.mubr.msk.bf16.mxu1 %vm268_vm0, %v1764_v50 }
 0x1db   :  { %1473 = vmatmul.mubr.msk.bf16.gmra.mrb[44].mxu1 %vm268_vm0, %v1773_v51 }
 0x1dc   :  { %1476 = vmatprep.mubr.msk.bf16.mxu1 %vm268_vm0, %v1778_v52 }
 0x1e3   :  { %1477 = vmatmul.mubr.msk.bf16.gmra.mrb[48].mxu1 %vm268_vm0, %v1787_v53 }
 0x1e4   :  { %1480 = vmatprep.mubr.msk.bf16.mxu1 %vm268_vm0, %v1792_v54 }
 0x1eb   :  { %1481 = vmatmul.mubr.msk.bf16.gmra.mrb[52].mxu1 %vm268_vm0, %v1801_v55 }
 0x1ec   :  { %1484 = vmatprep.mubr.msk.bf16.mxu1 %vm268_vm0, %v1806_v56 }
 0x1f3   :  { %1485 = vmatmul.mubr.msk.bf16.gmra.mrb[56].mxu1 %vm268_vm0, %v1815_v57 }
 0x1f4   :  { %1488 = vmatprep.mubr.msk.bf16.mxu1 %vm268_vm0, %v1820_v58 }
 0x1fb   :  { %1489 = vmatmul.mubr.msk.bf16.gmra.mrb[60].mxu1 %vm268_vm0, %v1829_v59 }
 0x256   :  { %v1422_v18 = vpop.f32.mrb[0].mxu1 }
 0x257   :  { %713 = vst.msk [vmem:[#allocation2 + $0x10] sm:$0xff] %vm710_vm2, %v1422_v18  ;;  %v583_v45 = vpop.f32.mrb[1].mxu1 }
 0x258   :  { %711 = vst.msk [vmem:[#allocation2] sm:$0xff] %vm710_vm2, %v583_v45  ;;  %v1423_v46 = vpop.f32.mrb[2].mxu1 }
 0x259   :  { %714 = vst.msk [vmem:[#allocation2 + $0x18] sm:$0xff] %vm710_vm2, %v1423_v46  ;;  %v586_v47 = vpop.f32.mrb[3].mxu1 }
 0x25a   :  { %712 = vst.msk [vmem:[#allocation2 + $0x8] sm:$0xff] %vm710_vm2, %v586_v47 }
 0x25e   :  { %v1426_v48 = vpop.f32.mrb[4].mxu1 }
 0x25f   :  { %717 = vst.msk [vmem:[#allocation2 + $0x30] sm:$0xff] %vm710_vm2, %v1426_v48  ;;  %v599_v9 = vpop.f32.mrb[5].mxu1 }
 0x260   :  { %715 = vst.msk [vmem:[#allocation2 + $0x20] sm:$0xff] %vm710_vm2, %v599_v9  ;;  %v1427_v50 = vpop.f32.mrb[6].mxu1 }
 0x261   :  { %718 = vst.msk [vmem:[#allocation2 + $0x38] sm:$0xff] %vm710_vm2, %v1427_v50  ;;  %v602_v51 = vpop.f32.mrb[7].mxu1 }
 0x262   :  { %716 = vst.msk [vmem:[#allocation2 + $0x28] sm:$0xff] %vm710_vm2, %v602_v51 }
 0x266   :  { %v1430_v52 = vpop.f32.mrb[8].mxu1 }
 0x267   :  { %721 = vst.msk [vmem:[#allocation2 + $0x50] sm:$0xff] %vm710_vm2, %v1430_v52  ;;  %v615_v53 = vpop.f32.mrb[9].mxu1 }
 0x268   :  { %719 = vst.msk [vmem:[#allocation2 + $0x40] sm:$0xff] %vm710_vm2, %v615_v53  ;;  %v1431_v54 = vpop.f32.mrb[10].mxu1 }
 0x269   :  { %722 = vst.msk [vmem:[#allocation2 + $0x58] sm:$0xff] %vm710_vm2, %v1431_v54  ;;  %v618_v55 = vpop.f32.mrb[11].mxu1 }
 0x26a   :  { %720 = vst.msk [vmem:[#allocation2 + $0x48] sm:$0xff] %vm710_vm2, %v618_v55 }
 0x26e   :  { %v1434_v56 = vpop.f32.mrb[12].mxu1 }
 0x26f   :  { %725 = vst.msk [vmem:[#allocation2 + $0x70] sm:$0xff] %vm710_vm2, %v1434_v56  ;;  %v631_v57 = vpop.f32.mrb[13].mxu1 }
 0x270   :  { %723 = vst.msk [vmem:[#allocation2 + $0x60] sm:$0xff] %vm710_vm2, %v631_v57  ;;  %v1435_v58 = vpop.f32.mrb[14].mxu1 }
 0x271   :  { %726 = vst.msk [vmem:[#allocation2 + $0x78] sm:$0xff] %vm710_vm2, %v1435_v58  ;;  %v634_v59 = vpop.f32.mrb[15].mxu1 }
 0x272   :  { %724 = vst.msk [vmem:[#allocation2 + $0x68] sm:$0xff] %vm710_vm2, %v634_v59 }
 0x276   :  { %v1438_v60 = vpop.f32.mrb[16].mxu1 }
 0x277   :  { %729 = vst.msk [vmem:[#allocation2 + $0x90] sm:$0xff] %vm710_vm2, %v1438_v60  ;;  %v647_v61 = vpop.f32.mrb[17].mxu1 }
 0x278   :  { %727 = vst.msk [vmem:[#allocation2 + $0x80] sm:$0xff] %vm710_vm2, %v647_v61  ;;  %v1439_v62 = vpop.f32.mrb[18].mxu1 }
 0x279   :  { %730 = vst.msk [vmem:[#allocation2 + $0x98] sm:$0xff] %vm710_vm2, %v1439_v62  ;;  %v650_v63 = vpop.f32.mrb[19].mxu1 }
 0x27a   :  { %728 = vst.msk [vmem:[#allocation2 + $0x88] sm:$0xff] %vm710_vm2, %v650_v63 }
 0x27e   :  { %v1442_v0 = vpop.f32.mrb[20].mxu1 }
 0x27f   :  { %733 = vst.msk [vmem:[#allocation2 + $0xb0] sm:$0xff] %vm710_vm2, %v1442_v0  ;;  %v663_v1 = vpop.f32.mrb[21].mxu1 }
 0x280   :  { %731 = vst.msk [vmem:[#allocation2 + $0xa0] sm:$0xff] %vm710_vm2, %v663_v1  ;;  %v1443_v2 = vpop.f32.mrb[22].mxu1 }
 0x281   :  { %734 = vst.msk [vmem:[#allocation2 + $0xb8] sm:$0xff] %vm710_vm2, %v1443_v2  ;;  %v666_v3 = vpop.f32.mrb[23].mxu1 }
 0x282   :  { %732 = vst.msk [vmem:[#allocation2 + $0xa8] sm:$0xff] %vm710_vm2, %v666_v3 }
 0x286   :  { %v1446_v5 = vpop.f32.mrb[24].mxu1 }
 0x287   :  { %737 = vst.msk [vmem:[#allocation2 + $0xd0] sm:$0xff] %vm710_vm2, %v1446_v5  ;;  %v679_v6 = vpop.f32.mrb[25].mxu1 }
 0x288   :  { %735 = vst.msk [vmem:[#allocation2 + $0xc0] sm:$0xff] %vm710_vm2, %v679_v6  ;;  %v1447_v7 = vpop.f32.mrb[26].mxu1 }
 0x289   :  { %738 = vst.msk [vmem:[#allocation2 + $0xd8] sm:$0xff] %vm710_vm2, %v1447_v7  ;;  %v682_v8 = vpop.f32.mrb[27].mxu1 }
 0x28a   :  { %736 = vst.msk [vmem:[#allocation2 + $0xc8] sm:$0xff] %vm710_vm2, %v682_v8 }
 0x28e   :  { %v1450_v10 = vpop.f32.mrb[28].mxu1 }
 0x28f   :  { %741 = vst.msk [vmem:[#allocation2 + $0xf0] sm:$0xff] %vm710_vm2, %v1450_v10  ;;  %v695_v49 = vpop.f32.mrb[29].mxu1 }
 0x290   :  { %739 = vst.msk [vmem:[#allocation2 + $0xe0] sm:$0xff] %vm710_vm2, %v695_v49  ;;  %v1451_v11 = vpop.f32.mrb[30].mxu1 }
 0x291   :  { %742 = vst.msk [vmem:[#allocation2 + $0xf8] sm:$0xff] %vm710_vm2, %v1451_v11  ;;  %v698_v12 = vpop.f32.mrb[31].mxu1 }
 0x292   :  { %740 = vst.msk [vmem:[#allocation2 + $0xe8] sm:$0xff] %vm710_vm2, %v698_v12 }
 0x296   :  { %v1462_v13 = vpop.f32.mrb[32].mxu1 }
 0x297   :  { %v814_v14 = vpop.f32.mrb[33].mxu1 }
 0x298   :  { %v1463_v4 = vpop.f32.mrb[34].mxu1 }
 0x299   :  { %v942_v15 = vpack.c.bf16 %v1463_v4, %v1462_v13  ;;  %v817_v16 = vpop.f32.mrb[35].mxu1 }
 0x29a   :  { %v941_v17 = vpack.c.bf16 %v817_v16, %v814_v14 }
 0x29c   :  { %1494 = vmatprep.mubr.msk.bf16.mxu0 %vm500_vm1, %v941_v17 }
 0x29d   :  { %1495 = vmatmul.mubr.msk.bf16.vlgmr.msra.gmra.mrb[32].mxu0 %vm500_vm1, %v942_v15 }
 0x29e   :  { %v1466_v19 = vpop.f32.mrb[36].mxu1 }
 0x29f   :  { %v830_v20 = vpop.f32.mrb[37].mxu1 }
 0x2a0   :  { %v1467_v21 = vpop.f32.mrb[38].mxu1 }
 0x2a1   :  { %v944_v22 = vpack.c.bf16 %v1467_v21, %v1466_v19  ;;  %v833_v23 = vpop.f32.mrb[39].mxu1 }
 0x2a2   :  { %v943_v24 = vpack.c.bf16 %v833_v23, %v830_v20 }
 0x2a4   :  { %1498 = vmatprep.mubr.msk.bf16.mxu0 %vm500_vm1, %v943_v24 }
 0x2a5   :  { %1499 = vmatmul.mubr.msk.bf16.gmra.mrb[36].mxu0 %vm500_vm1, %v944_v22 }
 0x2a6   :  { %v1470_v25 = vpop.f32.mrb[40].mxu1 }
 0x2a7   :  { %v846_v26 = vpop.f32.mrb[41].mxu1 }
 0x2a8   :  { %v1471_v27 = vpop.f32.mrb[42].mxu1 }
 0x2a9   :  { %v946_v28 = vpack.c.bf16 %v1471_v27, %v1470_v25  ;;  %v849_v29 = vpop.f32.mrb[43].mxu1 }
 0x2aa   :  { %v945_v30 = vpack.c.bf16 %v849_v29, %v846_v26 }
 0x2ac   :  { %1502 = vmatprep.mubr.msk.bf16.mxu0 %vm500_vm1, %v945_v30 }
 0x2ad   :  { %1503 = vmatmul.mubr.msk.bf16.gmra.mrb[40].mxu0 %vm500_vm1, %v946_v28 }
 0x2ae   :  { %v1474_v31 = vpop.f32.mrb[44].mxu1 }
 0x2af   :  { %v862_v32 = vpop.f32.mrb[45].mxu1 }
 0x2b0   :  { %v1475_v33 = vpop.f32.mrb[46].mxu1 }
 0x2b1   :  { %v948_v34 = vpack.c.bf16 %v1475_v33, %v1474_v31  ;;  %v865_v35 = vpop.f32.mrb[47].mxu1 }
 0x2b2   :  { %v947_v36 = vpack.c.bf16 %v865_v35, %v862_v32 }
 0x2b4   :  { %1506 = vmatprep.mubr.msk.bf16.mxu0 %vm500_vm1, %v947_v36 }
 0x2b5   :  { %1507 = vmatmul.mubr.msk.bf16.gmra.mrb[44].mxu0 %vm500_vm1, %v948_v34 }
 0x2b6   :  { %v1478_v37 = vpop.f32.mrb[48].mxu1 }
 0x2b7   :  { %v878_v38 = vpop.f32.mrb[49].mxu1 }
 0x2b8   :  { %v1479_v39 = vpop.f32.mrb[50].mxu1 }
 0x2b9   :  { %v950_v40 = vpack.c.bf16 %v1479_v39, %v1478_v37  ;;  %v881_v41 = vpop.f32.mrb[51].mxu1 }
 0x2ba   :  { %v949_v42 = vpack.c.bf16 %v881_v41, %v878_v38 }
 0x2bc   :  { %1510 = vmatprep.mubr.msk.bf16.mxu0 %vm500_vm1, %v949_v42 }
 0x2bd   :  { %1511 = vmatmul.mubr.msk.bf16.gmra.mrb[48].mxu0 %vm500_vm1, %v950_v40 }
 0x2be   :  { %v1482_v43 = vpop.f32.mrb[52].mxu1 }
 0x2bf   :  { %v894_v44 = vpop.f32.mrb[53].mxu1 }
 0x2c0   :  { %v1483_v18 = vpop.f32.mrb[54].mxu1 }
 0x2c1   :  { %v952_v45 = vpack.c.bf16 %v1483_v18, %v1482_v43  ;;  %v897_v46 = vpop.f32.mrb[55].mxu1 }
 0x2c2   :  { %v951_v47 = vpack.c.bf16 %v897_v46, %v894_v44 }
 0x2c4   :  { %1514 = vmatprep.mubr.msk.bf16.mxu0 %vm500_vm1, %v951_v47 }
 0x2c5   :  { %1515 = vmatmul.mubr.msk.bf16.gmra.mrb[52].mxu0 %vm500_vm1, %v952_v45 }
 0x2c6   :  { %v1486_v48 = vpop.f32.mrb[56].mxu1 }
 0x2c7   :  { %v910_v9 = vpop.f32.mrb[57].mxu1 }
 0x2c8   :  { %v1487_v50 = vpop.f32.mrb[58].mxu1 }
 0x2c9   :  { %v954_v51 = vpack.c.bf16 %v1487_v50, %v1486_v48  ;;  %v913_v52 = vpop.f32.mrb[59].mxu1 }
 0x2ca   :  { %v953_v53 = vpack.c.bf16 %v913_v52, %v910_v9 }
 0x2cc   :  { %1518 = vmatprep.mubr.msk.bf16.mxu0 %vm500_vm1, %v953_v53 }
 0x2cd   :  { %1519 = vmatmul.mubr.msk.bf16.gmra.mrb[56].mxu0 %vm500_vm1, %v954_v51 }
 0x2ce   :  { %v1490_v54 = vpop.f32.mrb[60].mxu1 }
 0x2cf   :  { %v926_v55 = vpop.f32.mrb[61].mxu1 }
 0x2d0   :  { %v1491_v56 = vpop.f32.mrb[62].mxu1 }
 0x2d1   :  { %v956_v57 = vpack.c.bf16 %v1491_v56, %v1490_v54  ;;  %v929_v58 = vpop.f32.mrb[63].mxu1 }
 0x2d2   :  { %v955_v59 = vpack.c.bf16 %v929_v58, %v926_v55 }
 0x2d4   :  { %1522 = vmatprep.mubr.msk.bf16.mxu0 %vm500_vm1, %v955_v59 }
 0x2d5   :  { %1523 = vmatmul.mubr.msk.bf16.gmra.mrb[60].mxu0 %vm500_vm1, %v956_v57 }
 0x370   :  { %v1496_v60 = vpop.f32.mrb[32].mxu0 }
 0x371   :  { %1169 = vst.msk [vmem:[#allocation2 + $0x110] sm:$0xff] %vm710_vm2, %v1496_v60  ;;  %v1039_v61 = vpop.f32.mrb[33].mxu0 }
 0x372   :  { %1167 = vst.msk [vmem:[#allocation2 + $0x100] sm:$0xff] %vm710_vm2, %v1039_v61  ;;  %v1497_v62 = vpop.f32.mrb[34].mxu0 }
 0x373   :  { %1170 = vst.msk [vmem:[#allocation2 + $0x118] sm:$0xff] %vm710_vm2, %v1497_v62  ;;  %v1042_v63 = vpop.f32.mrb[35].mxu0 }
 0x374   :  { %1168 = vst.msk [vmem:[#allocation2 + $0x108] sm:$0xff] %vm710_vm2, %v1042_v63 }
 0x378   :  { %v1500_v0 = vpop.f32.mrb[36].mxu0 }
 0x379   :  { %1173 = vst.msk [vmem:[#allocation2 + $0x130] sm:$0xff] %vm710_vm2, %v1500_v0  ;;  %v1055_v1 = vpop.f32.mrb[37].mxu0 }
 0x37a   :  { %1171 = vst.msk [vmem:[#allocation2 + $0x120] sm:$0xff] %vm710_vm2, %v1055_v1  ;;  %v1501_v2 = vpop.f32.mrb[38].mxu0 }
 0x37b   :  { %1174 = vst.msk [vmem:[#allocation2 + $0x138] sm:$0xff] %vm710_vm2, %v1501_v2  ;;  %v1058_v3 = vpop.f32.mrb[39].mxu0 }
 0x37c   :  { %1172 = vst.msk [vmem:[#allocation2 + $0x128] sm:$0xff] %vm710_vm2, %v1058_v3 }
 0x380   :  { %v1504_v5 = vpop.f32.mrb[40].mxu0 }
 0x381   :  { %1177 = vst.msk [vmem:[#allocation2 + $0x150] sm:$0xff] %vm710_vm2, %v1504_v5  ;;  %v1071_v6 = vpop.f32.mrb[41].mxu0 }
 0x382   :  { %1175 = vst.msk [vmem:[#allocation2 + $0x140] sm:$0xff] %vm710_vm2, %v1071_v6  ;;  %v1505_v7 = vpop.f32.mrb[42].mxu0 }
 0x383   :  { %1178 = vst.msk [vmem:[#allocation2 + $0x158] sm:$0xff] %vm710_vm2, %v1505_v7  ;;  %v1074_v8 = vpop.f32.mrb[43].mxu0 }
 0x384   :  { %1176 = vst.msk [vmem:[#allocation2 + $0x148] sm:$0xff] %vm710_vm2, %v1074_v8 }
 0x388   :  { %v1508_v10 = vpop.f32.mrb[44].mxu0 }
 0x389   :  { %1181 = vst.msk [vmem:[#allocation2 + $0x170] sm:$0xff] %vm710_vm2, %v1508_v10  ;;  %v1087_v49 = vpop.f32.mrb[45].mxu0 }
 0x38a   :  { %1179 = vst.msk [vmem:[#allocation2 + $0x160] sm:$0xff] %vm710_vm2, %v1087_v49  ;;  %v1509_v11 = vpop.f32.mrb[46].mxu0 }
 0x38b   :  { %1182 = vst.msk [vmem:[#allocation2 + $0x178] sm:$0xff] %vm710_vm2, %v1509_v11  ;;  %v1090_v12 = vpop.f32.mrb[47].mxu0 }
 0x38c   :  { %1180 = vst.msk [vmem:[#allocation2 + $0x168] sm:$0xff] %vm710_vm2, %v1090_v12 }
 0x390   :  { %v1512_v13 = vpop.f32.mrb[48].mxu0 }
 0x391   :  { %1185 = vst.msk [vmem:[#allocation2 + $0x190] sm:$0xff] %vm710_vm2, %v1512_v13  ;;  %v1103_v14 = vpop.f32.mrb[49].mxu0 }
 0x392   :  { %1183 = vst.msk [vmem:[#allocation2 + $0x180] sm:$0xff] %vm710_vm2, %v1103_v14  ;;  %v1513_v4 = vpop.f32.mrb[50].mxu0 }
 0x393   :  { %1186 = vst.msk [vmem:[#allocation2 + $0x198] sm:$0xff] %vm710_vm2, %v1513_v4  ;;  %v1106_v15 = vpop.f32.mrb[51].mxu0 }
 0x394   :  { %1184 = vst.msk [vmem:[#allocation2 + $0x188] sm:$0xff] %vm710_vm2, %v1106_v15 }
 0x398   :  { %v1516_v16 = vpop.f32.mrb[52].mxu0 }
 0x399   :  { %1189 = vst.msk [vmem:[#allocation2 + $0x1b0] sm:$0xff] %vm710_vm2, %v1516_v16  ;;  %v1119_v17 = vpop.f32.mrb[53].mxu0 }
 0x39a   :  { %1187 = vst.msk [vmem:[#allocation2 + $0x1a0] sm:$0xff] %vm710_vm2, %v1119_v17  ;;  %v1517_v19 = vpop.f32.mrb[54].mxu0 }
 0x39b   :  { %1190 = vst.msk [vmem:[#allocation2 + $0x1b8] sm:$0xff] %vm710_vm2, %v1517_v19  ;;  %v1122_v20 = vpop.f32.mrb[55].mxu0 }
 0x39c   :  { %1188 = vst.msk [vmem:[#allocation2 + $0x1a8] sm:$0xff] %vm710_vm2, %v1122_v20 }
 0x3a0   :  { %v1520_v21 = vpop.f32.mrb[56].mxu0 }
 0x3a1   :  { %1193 = vst.msk [vmem:[#allocation2 + $0x1d0] sm:$0xff] %vm710_vm2, %v1520_v21  ;;  %v1135_v22 = vpop.f32.mrb[57].mxu0 }
 0x3a2   :  { %1191 = vst.msk [vmem:[#allocation2 + $0x1c0] sm:$0xff] %vm710_vm2, %v1135_v22  ;;  %v1521_v23 = vpop.f32.mrb[58].mxu0 }
 0x3a3   :  { %1194 = vst.msk [vmem:[#allocation2 + $0x1d8] sm:$0xff] %vm710_vm2, %v1521_v23  ;;  %v1138_v24 = vpop.f32.mrb[59].mxu0 }
 0x3a4   :  { %1192 = vst.msk [vmem:[#allocation2 + $0x1c8] sm:$0xff] %vm710_vm2, %v1138_v24 }
 0x3a8   :  { %v1524_v25 = vpop.f32.mrb[60].mxu0 }
 0x3a9   :  { %1197 = vst.msk [vmem:[#allocation2 + $0x1f0] sm:$0xff] %vm710_vm2, %v1524_v25  ;;  %v1151_v26 = vpop.f32.mrb[61].mxu0 }
 0x3aa   :  { %1195 = vst.msk [vmem:[#allocation2 + $0x1e0] sm:$0xff] %vm710_vm2, %v1151_v26  ;;  %v1525_v27 = vpop.f32.mrb[62].mxu0 }
 0x3ab   :  { %1198 = vst.msk [vmem:[#allocation2 + $0x1f8] sm:$0xff] %vm710_vm2, %v1525_v27  ;;  %v1154_v28 = vpop.f32.mrb[63].mxu0 }
 0x3ac   :  { %1196 = vst.msk [vmem:[#allocation2 + $0x1e8] sm:$0xff] %vm710_vm2, %v1154_v28 }
 0x3ad   :  { %1560 = shalt.err (!%p1557_p4)
}
 0x3ae   :  { %s1561_s9 = scalar_lea.hbm %s1985_s5, 8192 }
 0x3af   :  { %p1562_p5 = scmp.ne.s32.totalorder %s1985_s5, %s1561_s9  ;;  %p1565_p6 = scmp.lt.u32.totalorder %s1561_s9, %s1985_s5 }
 0x3b1   :  { %p1567_p7 = pnand %p1565_p6, %p1562_p5 }
 0x3b3   :  { %1570 = shalt.err (!%p1567_p7)
}
 0x3b4   :  { %s1575_s14 = smov 128   ;;  %s1576_s15 = smov 8  }
 0x3b5   :  { %1210 = dma.vmem_to_hbm [thread:$0]  %s1205_s2, 8192, %s1985_s5, [#allocation3], %s1575_s14, %s1575_s14, %s1576_s15  }
 0x3b6   :  { %1571 = dma.done.wait [#allocation3], 8192  }
 0x3b7   :  { %1572 = vsyncadd [#allocation3], 4294959104 }
 0x3b8   :  { %1214 = vsyncpa [#allocation3], 1 }

</bundles_post_ra>
